<compile_context>
chip_gen: v5e
topology: v5e:2x2
jax: 0.10.0
libtpu: 0.0.40
codegen_flags: <defaults>
</compile_context>

<pallas_src>
import functools
import math

import jax
import jax.numpy as jnp
from jax.experimental import pallas as pl
from jax.experimental.pallas import tpu as pltpu


# ------------------------------ tiling helpers -------------------------------

_TM_MAX, _TN_MAX, _TK_MAX = 1024, 512, 1024


def _round_up(x, m):
    return ((x + m - 1) // m) * m


def _pick_tile(dim128, cap):
    """dim128 is a multiple of 128.  Pick a tile (multiple of 128, <= cap) that
    minimises padding (exact divisor when one exists); prefer the larger tile on
    ties.  Returns (tile, padded_dim)."""
    best_t, best_pad = 128, _round_up(dim128, 128)
    t = 128
    while t <= min(cap, dim128):
        pad = _round_up(dim128, t)
        if pad < best_pad or (pad == best_pad and t > best_t):
            best_t, best_pad = t, pad
        t += 128
    return best_t, best_pad


def _largest_div_128(dim, cap):
    best, t = 128, 128
    while t <= min(cap, dim):
        if dim % t == 0:
            best = t
        t += 128
    return best


def _choose_tiles(M, K, N):
    Mp, Kp, Np = _round_up(M, 128), _round_up(K, 128), _round_up(N, 128)
    TM, Mp = _pick_tile(Mp, _TM_MAX)
    TK, Kp = _pick_tile(Kp, _TK_MAX)
    TN, Np = _pick_tile(Np, _TN_MAX)
    # Megacore: if one (i, j) tile covers the whole output and M allows it, split M
    # so both TensorCores get a "parallel" grid slice.
    if Mp // TM == 1 and Np // TN == 1 and Mp > 128:
        TM = _largest_div_128(Mp, Mp // 2)
    return (Mp, Kp, Np), (TM, TK, TN)


def _pad_cast(a, rows, cols, dtype):
    r, c = a.shape
    return jnp.pad(a, ((0, rows - r), (0, cols - c))).astype(dtype)


# ------------------------------- Pallas kernel --------------------------------

def _matmul_bias_kernel(x_ref, w_ref, b_ref, o_ref, acc_ref, *, relu):
    """o = X @ W + bias [+ ReLU]; K-tiled, f32 VMEM accumulator, BN scale pre-folded
    into W.  Output cast to o_ref.dtype in the epilogue (bf16 for intermediates)."""
    k = pl.program_id(2)
    prod = jnp.dot(x_ref[...], w_ref[...], preferred_element_type=jnp.float32)

    @pl.when(k == 0)
    def _():
        acc_ref[...] = prod          # first K step: write directly, no zero-fill

    @pl.when(k > 0)
    def _():
        acc_ref[...] += prod

    @pl.when(k == pl.num_programs(2) - 1)
    def _():
        y = acc_ref[...] + b_ref[...]
        if relu:
            y = jnp.maximum(y, 0.0)
        o_ref[...] = y.astype(o_ref.dtype)


# --------------------------- pallas_call wrapper ------------------------------

def fused_matmul_bias(x_rows, w_mat, bias, *, relu, out_dtype=jnp.float32):
    """x_rows: (M, K) im2col rows; w_mat: (K, N) f32 with BN scale folded in;
    bias: (N,) f32.  Returns (M, N) in out_dtype."""
    M, K = x_rows.shape
    N = w_mat.shape[1]
    (Mp, Kp, Np), (TM, TK, TN) = _choose_tiles(M, K, N)

    xp = _pad_cast(x_rows, Mp, Kp, jnp.bfloat16)
    wp = _pad_cast(w_mat, Kp, Np, jnp.bfloat16)
    bp = _pad_cast(bias.reshape(1, -1), 1, Np, jnp.float32)

    out_bytes = jnp.dtype(out_dtype).itemsize
    # Double-buffered X/W/out tiles + f32 accumulator + bias block, with headroom.
    working = 2 * (TM * TK * 2 + TK * TN * 2 + TM * TN * out_bytes) + TM * TN * 4 + 4 * TN
    vmem_limit = int(min(max(working * 3 // 2, 32 << 20), 48 << 20))

    out = pl.pallas_call(
        functools.partial(_matmul_bias_kernel, relu=relu),
        out_shape=jax.ShapeDtypeStruct((Mp, Np), out_dtype),
        grid_spec=pltpu.PrefetchScalarGridSpec(
            num_scalar_prefetch=0,
            grid=(Mp // TM, Np // TN, Kp // TK),
            in_specs=[
                pl.BlockSpec((TM, TK), lambda i, j, k: (i, k)),
                pl.BlockSpec((TK, TN), lambda i, j, k: (k, j)),
                pl.BlockSpec((1, TN), lambda i, j, k: (0, j)),   # resident across i, k
            ],
            out_specs=pl.BlockSpec((TM, TN), lambda i, j, k: (i, j)),
            scratch_shapes=[pltpu.VMEM((TM, TN), jnp.float32)],
        ),
        compiler_params=pltpu.CompilerParams(
            dimension_semantics=("parallel", "parallel", "arbitrary"),
            vmem_limit_bytes=vmem_limit),
    )(xp, wp, bp)
    return out[:M, :N]


# --------------------------------- Glue -------------------------------------

def im2col(x_nhwc, kh, kw, stride, pad):
    """Extract conv patches.  Returns (N*Ho*Wo, kh*kw*C) rows and output grid shape."""
    N, H, W, C = x_nhwc.shape
    xp = jnp.pad(x_nhwc, ((0, 0), (pad, pad), (pad, pad), (0, 0)))
    Ho = (H + 2 * pad - kh) // stride + 1
    Wo = (W + 2 * pad - kw) // stride + 1
    patches = []
    for i in range(kh):
        for j in range(kw):
            patches.append(xp[:, i:i + stride * Ho:stride, j:j + stride * Wo:stride, :])
    X = jnp.concatenate(patches, axis=-1)            # (N, Ho, Wo, kh*kw*C)
    return X.reshape(N * Ho * Wo, kh * kw * C), (N, Ho, Wo)


def _weight_to_mat(w_oihw):
    """(Cout, Cin, kh, kw) -> (kh*kw*Cin, Cout), matching im2col row ordering."""
    Cout, Cin, kh, kw = w_oihw.shape
    return jnp.transpose(w_oihw, (2, 3, 1, 0)).reshape(kh * kw * Cin, Cout)


def _fold_bn(gamma, beta, mean, var, eps=1e-5):
    scale = gamma / jnp.sqrt(var + eps)
    bias = beta - mean * scale
    return scale, bias


def init_params(key, in_channels, out_channels, kernel=3):
    ks = jax.random.split(key, 9)

    def conv_w(k, cout, cin, kh, kw):
        fan_in = cin * kh * kw
        bound = 1.0 / math.sqrt(fan_in)
        return jax.random.uniform(k, (cout, cin, kh, kw), jnp.float32, -bound, bound)

    def bn(kg, kb, c):
        gamma = 1.0 + 0.1 * jax.random.normal(kg, (c,), jnp.float32)
        beta = 0.1 * jax.random.normal(kb, (c,), jnp.float32)
        mean = jnp.zeros((c,), jnp.float32)
        var = jnp.ones((c,), jnp.float32)
        return gamma, beta, mean, var

    p = {}
    p["w1"] = conv_w(ks[0], out_channels, in_channels, kernel, kernel)
    p["bn1"] = bn(ks[1], ks[2], out_channels)
    p["w2"] = conv_w(ks[3], out_channels, out_channels, kernel, kernel)
    p["bn2"] = bn(ks[4], ks[5], out_channels)
    p["w_ds"] = conv_w(ks[6], out_channels, in_channels, 1, 1)
    p["bn_ds"] = bn(ks[7], ks[8], out_channels)
    return p


def basic_encoder_block_forward(x_nchw, params, *, kernel=3, stride=2, padding=1):
    Cout = params["w1"].shape[0]
    # NHWC, bf16 activations (half-width im2col slab in HBM).
    x = jnp.transpose(x_nchw, (0, 2, 3, 1)).astype(jnp.bfloat16)

    s1, b1 = _fold_bn(*params["bn1"])
    s2, b2 = _fold_bn(*params["bn2"])
    sd, bd = _fold_bn(*params["bn_ds"])

    # Fold BN scale into the weight matrices in f32 (before the in-wrapper bf16 cast).
    w1m = _weight_to_mat(params["w1"]) * s1[None, :]
    w2m = _weight_to_mat(params["w2"]) * s2[None, :]
    wdm = _weight_to_mat(params["w_ds"]) * sd[None, :]

    # conv1 (kxk, stride, pad) + BN + ReLU; bf16 output cast inside the kernel epilogue.
    X1, (N, Ho, Wo) = im2col(x, kernel, kernel, stride, padding)
    h1 = fused_matmul_bias(X1, w1m, b1, relu=True, out_dtype=jnp.bfloat16)
    h1 = h1.reshape(N, Ho, Wo, Cout)

    # conv2 (kxk, stride 1) + BN and the 1x1 strided downsample conv + BN share the same
    # output grid, so the downsample joins conv2's K reduction: K = kh*kw*Cout + Cin.
    X2, _ = im2col(h1, kernel, kernel, 1, kernel // 2)
    Xd, _ = im2col(x, 1, 1, stride, 0)
    assert X2.shape[0] == Xd.shape[0]
    Xcat = jnp.concatenate([X2, Xd], axis=1)
    Wcat = jnp.concatenate([w2m, wdm], axis=0)
    out = fused_matmul_bias(Xcat, Wcat, b2 + bd, relu=True, out_dtype=jnp.float32)

    out = out.reshape(N, Ho, Wo, Cout)
    return jnp.transpose(out, (0, 3, 1, 2))          # back to NCHW


# ----------------------------- Pure-JAX reference ----------------------------

def _ref_conv(x_nchw, w, stride, pad):
    return jax.lax.conv_general_dilated(
        x_nchw, w, (stride, stride), [(pad, pad), (pad, pad)],
        dimension_numbers=("NCHW", "OIHW", "NCHW"))


def reference_forward(x_nchw, params, *, kernel=3, stride=2, padding=1):
    def bn(y, bn_params):
        gamma, beta, mean, var = bn_params
        s, b = _fold_bn(gamma, beta, mean, var)
        return y * s[None, :, None, None] + b[None, :, None, None]

    ds = bn(_ref_conv(x_nchw, params["w_ds"], stride, 0), params["bn_ds"])
    h1 = jnp.maximum(bn(_ref_conv(x_nchw, params["w1"], stride, padding), params["bn1"]), 0.0)
    h2 = bn(_ref_conv(h1, params["w2"], 1, kernel // 2), params["bn2"])
    return jnp.maximum(h2 + ds, 0.0)


# ---------------------------------- Main -------------------------------------

if __name__ == "__main__":
    key = jax.random.PRNGKey(0)
    k_x, k_p = jax.random.split(key)

    N, Cin, H, W = 2, 4, 16, 16
    Cout = 8

    x = jax.random.normal(k_x, (N, Cin, H, W), jnp.float32)
    params = init_params(k_p, Cin, Cout, kernel=3)

    out = jax.block_until_ready(
        basic_encoder_block_forward(x, params, kernel=3, stride=2, padding=1))
    ref = jax.block_until_ready(
        reference_forward(x, params, kernel=3, stride=2, padding=1))

    assert out.shape == (N, Cout, H // 2, W // 2), out.shape
    # bf16 MXU inputs and bf16 h1 intermediate (f32 accumulation / f32 epilogue).
    assert jnp.allclose(out, ref, atol=5e-2, rtol=5e-2), float(jnp.max(jnp.abs(out - ref)))

    print("KERNEL_OK")
</pallas_src>

<mosaic_0001>
module attributes {stable_mosaic.version = 11 : i64} {
  func.func @_matmul_bias_kernel(%arg0: i32, %arg1: i32, %arg2: i32, %arg3: memref<128x128xbf16, #tpu.memory_space<vmem>>, %arg4: memref<128x128xbf16, #tpu.memory_space<vmem>>, %arg5: memref<1x128xf32, #tpu.memory_space<vmem>>, %arg6: memref<128x128xbf16, #tpu.memory_space<vmem>>, %arg7: memref<128x128xf32, #tpu.memory_space<vmem>>) attributes {dimension_semantics = [#tpu.dimension_semantics<parallel>, #tpu.dimension_semantics<parallel>, #tpu.dimension_semantics<arbitrary>], iteration_bounds = array<i64: 1, 1, 1>, scalar_prefetch = 0 : i64, scratch_operands = 1 : i64, tpu.core_type = #tpu.core_type<tc>, window_params = [{transform_indices = @transform_0, window_bounds = array<i64: 128, 128>}, {transform_indices = @transform_1, window_bounds = array<i64: 128, 128>}, {transform_indices = @transform_2, window_bounds = array<i64: 1, 128>}, {transform_indices = @transform_3, window_bounds = array<i64: 128, 128>}]} {
    %c0 = arith.constant 0 : index
    %c0_0 = arith.constant 0 : index
    %0 = vector.load %arg3[%c0, %c0_0] : memref<128x128xbf16, #tpu.memory_space<vmem>>, vector<128x128xbf16>
    %c0_1 = arith.constant 0 : index
    %c0_2 = arith.constant 0 : index
    %1 = vector.load %arg4[%c0_1, %c0_2] : memref<128x128xbf16, #tpu.memory_space<vmem>>, vector<128x128xbf16>
    %cst = arith.constant dense<0.000000e+00> : vector<128x128xf32>
    %2 = tpu.matmul %0, %1, %cst {dimension_numbers = #tpu.dot_dimension_numbers<[1], [0], [0], [1], [0, 0, 1, 1], [], []>} : vector<128x128xbf16>, vector<128x128xbf16>, vector<128x128xf32> -> vector<128x128xf32>
    %c0_i32 = arith.constant 0 : i32
    %3 = arith.cmpi eq, %arg2, %c0_i32 : i32
    %4 = arith.extui %3 : i1 to i32
    %c0_i32_3 = arith.constant 0 : i32
    %5 = arith.cmpi ne, %4, %c0_i32_3 : i32
    scf.if %5 {
      %c0_8 = arith.constant 0 : index
      %c0_9 = arith.constant 0 : index
      %12 = vector.load %arg7[%c0_8, %c0_9] : memref<128x128xf32, #tpu.memory_space<vmem>>, vector<128x128xf32>
      tpu.vector_store %arg7[%c0_8, %c0_9], %2 {strides = array<i32>} : memref<128x128xf32, #tpu.memory_space<vmem>>, vector<128x128xf32>,
    } else {
    }
    %c0_i32_4 = arith.constant 0 : i32
    %6 = arith.cmpi sgt, %arg2, %c0_i32_4 : i32
    %7 = arith.extui %6 : i1 to i32
    %c0_i32_5 = arith.constant 0 : i32
    %8 = arith.cmpi ne, %7, %c0_i32_5 : i32
    scf.if %8 {
      %c0_8 = arith.constant 0 : index
      %c0_9 = arith.constant 0 : index
      %12 = vector.load %arg7[%c0_8, %c0_9] : memref<128x128xf32, #tpu.memory_space<vmem>>, vector<128x128xf32>
      %13 = arith.addf %12, %2 : vector<128x128xf32>
      %c0_10 = arith.constant 0 : index
      %c0_11 = arith.constant 0 : index
      %14 = vector.load %arg7[%c0_10, %c0_11] : memref<128x128xf32, #tpu.memory_space<vmem>>, vector<128x128xf32>
      tpu.vector_store %arg7[%c0_10, %c0_11], %13 {strides = array<i32>} : memref<128x128xf32, #tpu.memory_space<vmem>>, vector<128x128xf32>,
    } else {
    }
    %c0_i32_6 = arith.constant 0 : i32
    %9 = arith.cmpi eq, %arg2, %c0_i32_6 : i32
    %10 = arith.extui %9 : i1 to i32
    %c0_i32_7 = arith.constant 0 : i32
    %11 = arith.cmpi ne, %10, %c0_i32_7 : i32
    scf.if %11 {
      %c0_8 = arith.constant 0 : index
      %c0_9 = arith.constant 0 : index
      %12 = vector.load %arg7[%c0_8, %c0_9] : memref<128x128xf32, #tpu.memory_space<vmem>>, vector<128x128xf32>
      %c0_10 = arith.constant 0 : index
      %c0_11 = arith.constant 0 : index
      %13 = vector.load %arg5[%c0_10, %c0_11] : memref<1x128xf32, #tpu.memory_space<vmem>>, vector<1x128xf32>
      %14 = vector.broadcast %13 : vector<1x128xf32> to vector<128x128xf32>
      %15 = arith.addf %12, %14 : vector<128x128xf32>
      %cst_12 = arith.constant 0.000000e+00 : f32
      %16 = vector.broadcast %cst_12 : f32 to vector<128x128xf32>
      %17 = arith.maximumf %15, %16 : vector<128x128xf32>
      %18 = arith.truncf %17 : vector<128x128xf32> to vector<128x128xbf16>
      %c0_13 = arith.constant 0 : index
      %c0_14 = arith.constant 0 : index
      %19 = vector.load %arg6[%c0_13, %c0_14] : memref<128x128xbf16, #tpu.memory_space<vmem>>, vector<128x128xbf16>
      tpu.vector_store %arg6[%c0_13, %c0_14], %18 {strides = array<i32>} : memref<128x128xbf16, #tpu.memory_space<vmem>>, vector<128x128xbf16>,
    } else {
    }
    return
  }
  func.func @transform_0(%arg0: i32, %arg1: i32, %arg2: i32) -> (i32, i32) {
    %c0_i32 = arith.constant 0 : i32
    return %arg0, %arg2 : i32, i32
  }
  func.func @transform_1(%arg0: i32, %arg1: i32, %arg2: i32) -> (i32, i32) {
    %c0_i32 = arith.constant 0 : i32
    return %arg2, %arg1 : i32, i32
  }
  func.func @transform_2(%arg0: i32, %arg1: i32, %arg2: i32) -> (i32, i32) {
    %c0_i32 = arith.constant 0 : i32
    %c0_i32_0 = arith.constant 0 : i32
    return %c0_i32, %arg1 : i32, i32
  }
  func.func @transform_3(%arg0: i32, %arg1: i32, %arg2: i32) -> (i32, i32) {
    %c0_i32 = arith.constant 0 : i32
    return %arg0, %arg1 : i32, i32
  }
}

</mosaic_0001>

<bundles_post_ra>
// kernel: tpu_custom_call.1
= control target key start
LH: loop header
LB: loop body
LE: loop exit
PB: predicated region body
PF: predicated region fallthrough
CT: control target
= control target key end

     0   :  { %8 = vsyncpa [#allocation4], 0  ;;  %s684_s0 = inlined_call_operand.hbm [shape: bf16[128,128], index: 0, kind: input, shape index: {}]   ;;  %s685_s1 = inlined_call_operand.hbm [shape: bf16[128,128], index: 1, kind: input, shape index: {}]   ;;  %s686_s2 = inlined_call_operand.vmem [shape: f32[1,128], index: 2, kind: input, shape index: {}]   ;;  %s687_s3 = inlined_call_operand.hbm [shape: bf16[128,128], index: 3, kind: output, shape index: {}]  }
   0x1   :  { %9 = vsyncpa [#allocation7], 0 }
   0x2   :  { %10 = vsyncpa [#allocation5], 0  ;;  %s15_s14 = sshll.u32 %s684_s0, 4  ;;  %s638_s15 = smov [#allocation3]   ;;  %s16_s14 = int_to_ptr.hbm [resolvable:$true] %s15_s14 }
   0x3   :  { %s17_s16 = sshll.u32 %s638_s15, 4  ;;  %s28_s19 = sshll.u32 %s685_s1, 4  ;;  %s18_s16 = int_to_ptr.vmem [resolvable:$true] %s17_s16  ;;  %s29_s19 = int_to_ptr.hbm [resolvable:$true] %s28_s19 }
   0x4   :  { %s639_s20 = smov 64   ;;  %s640_s21 = smov 4  }
   0x5   :  { %23 = dma.hbm_to_vmem [thread:$0]  %s16_s14, 1024, %s18_s16, [#allocation4], %s639_s20, %s639_s20, %s640_s21  }
   0x6   :  { %s641_s22 = smov [#allocation6]  }
   0x7   :  { %s30_s23 = sshll.u32 %s641_s22, 4  ;;  %s31_s23 = int_to_ptr.vmem [resolvable:$true] %s30_s23 }
   0x8   :  { %36 = dma.hbm_to_vmem [thread:$0]  %s29_s19, 1024, %s31_s23, [#allocation7], %s639_s20, %s639_s20, %s640_s21  }
   0x9   :  { %632 = dma.done.wait [#allocation4], 1024  }
   0xa   :  { %633 = vsyncadd [#allocation4], 4294966272 }
   0xb   :  { %634 = dma.done.wait [#allocation7], 1024  }
   0xc   :  { %635 = vsyncadd [#allocation7], 4294966272  ;;  %v482_v0 = vld [vmem:[#allocation6 + $0x38] sm:$0xff]  ;;  %v481_v1 = vld [vmem:[#allocation6 + $0x30] sm:$0xff]  ;;  %s389_s27 = sshll.u32 %s687_s3, 4  ;;  %s390_s27 = int_to_ptr.hbm [resolvable:$true] %s389_s27 }
   0xd   :  { %175 = vmatpush.bf16.msra.mxu0 %v482_v0  ;;  %530 = vmatpush.bf16.msra.mxu1 %v482_v0  ;;  %v480_v2 = vld [vmem:[#allocation6 + $0x28] sm:$0xff]  ;;  %v479_v3 = vld [vmem:[#allocation6 + $0x20] sm:$0xff]  ;;  %v478_v4 = vld [vmem:[#allocation6 + $0x18] sm:$0xff] }
   0xe   :  { %531 = vmatpush.bf16.msra.mxu2 %v482_v0  ;;  %532 = vmatpush.bf16.msra.mxu3 %v482_v0  ;;  %v477_v5 = vld [vmem:[#allocation6 + $0x10] sm:$0xff]  ;;  %v476_v6 = vld [vmem:[#allocation6 + $0x8] sm:$0xff]  ;;  %v475_v7 = vld [vmem:[#allocation6] sm:$0xff] }
   0xf   :  { %v467_v8 = vld [vmem:[#allocation3] sm:$0xff]  ;;  %v469_v9 = vld [vmem:[#allocation3 + $0x10] sm:$0xff]  ;;  %v468_v12 = vld [vmem:[#allocation3 + $0x8] sm:$0xff] }
  0x10   :  { %v471_v10 = vld [vmem:[#allocation3 + $0x20] sm:$0xff]  ;;  %v473_v11 = vld [vmem:[#allocation3 + $0x30] sm:$0xff]  ;;  %v470_v13 = vld [vmem:[#allocation3 + $0x18] sm:$0xff] }
  0x11   :  { %176 = vmatpush.bf16.msra.mxu0 %v481_v1  ;;  %533 = vmatpush.bf16.msra.mxu1 %v481_v1  ;;  %v472_v14 = vld [vmem:[#allocation3 + $0x28] sm:$0xff]  ;;  %v474_v15 = vld [vmem:[#allocation3 + $0x38] sm:$0xff]  ;;  %v559_v18 = vld [vmem:[%s686_s2] ss:$0 sm:$0xff]  ;;  %s642_s2 = smov [#allocation8]  }
  0x12   :  { %534 = vmatpush.bf16.msra.mxu2 %v481_v1  ;;  %535 = vmatpush.bf16.msra.mxu3 %v481_v1  ;;  %s387_s24 = sshll.u32 %s642_s2, 4  ;;  %s388_s24 = int_to_ptr.vmem [resolvable:$true] %s387_s24 }
  0x15   :  { %177 = vmatpush.bf16.msra.mxu0 %v480_v2  ;;  %536 = vmatpush.bf16.msra.mxu1 %v480_v2 }
  0x16   :  { %537 = vmatpush.bf16.msra.mxu2 %v480_v2  ;;  %538 = vmatpush.bf16.msra.mxu3 %v480_v2 }
  0x19   :  { %178 = vmatpush.bf16.msra.mxu0 %v479_v3  ;;  %539 = vmatpush.bf16.msra.mxu1 %v479_v3 }
  0x1a   :  { %540 = vmatpush.bf16.msra.mxu2 %v479_v3  ;;  %541 = vmatpush.bf16.msra.mxu3 %v479_v3 }
  0x1d   :  { %179 = vmatpush.bf16.msra.mxu0 %v478_v4  ;;  %542 = vmatpush.bf16.msra.mxu1 %v478_v4 }
  0x1e   :  { %543 = vmatpush.bf16.msra.mxu2 %v478_v4  ;;  %544 = vmatpush.bf16.msra.mxu3 %v478_v4 }
  0x21   :  { %180 = vmatpush.bf16.msra.mxu0 %v477_v5  ;;  %545 = vmatpush.bf16.msra.mxu1 %v477_v5 }
  0x22   :  { %546 = vmatpush.bf16.msra.mxu2 %v477_v5  ;;  %547 = vmatpush.bf16.msra.mxu3 %v477_v5 }
  0x25   :  { %181 = vmatpush.bf16.msra.mxu0 %v476_v6  ;;  %548 = vmatpush.bf16.msra.mxu1 %v476_v6 }
  0x26   :  { %549 = vmatpush.bf16.msra.mxu2 %v476_v6  ;;  %550 = vmatpush.bf16.msra.mxu3 %v476_v6 }
  0x29   :  { %182 = vmatpush.bf16.msra.mxu0 %v475_v7  ;;  %551 = vmatpush.bf16.msra.mxu1 %v475_v7 }
  0x2a   :  { %552 = vmatpush.bf16.msra.mxu2 %v475_v7  ;;  %553 = vmatpush.bf16.msra.mxu3 %v475_v7 }
  0x2c   :  { %183 = vmatmul.bf16.vlgmr.msra.gmra.mxu0 %v467_v8  ;;  %193 = vmatmul.bf16.vlgmr.msra.gmra.mxu1 %v469_v9 }
  0x2d   :  { %203 = vmatmul.bf16.vlgmr.msra.gmra.mxu2 %v471_v10  ;;  %213 = vmatmul.bf16.vlgmr.msra.gmra.mxu3 %v473_v11 }
  0x3c   :  { %188 = vmatmul.bf16.gmra.mxu0 %v468_v12  ;;  %198 = vmatmul.bf16.gmra.mxu1 %v470_v13 }
  0x3d   :  { %208 = vmatmul.bf16.gmra.mxu2 %v472_v14  ;;  %218 = vmatmul.bf16.gmra.mxu3 %v474_v15 }
  0xa9   :  { %v184_v16 = vpop.f32.mrf.mxu0  ;;  %v194_v17 = vpop.f32.mrf.mxu1 }
  0xaa   :  { %v319_v19 = vadd.f32 %v559_v18, %v184_v16  ;;  %v323_v20 = vadd.f32 %v559_v18, %v194_v17 }
  0xac   :  { %v335_v27 = vmax.f32 %v319_v19, 0.0  ;;  %v339_v28 = vmax.f32 %v323_v20, 0.0 }
  0xb0   :  { %v204_v21 = vpop.f32.mrf.mxu2  ;;  %v214_v22 = vpop.f32.mrf.mxu3 }
  0xb1   :  { %v186_v23 = vpop.f32.mrf.mxu0  ;;  %v196_v24 = vpop.f32.mrf.mxu1  ;;  %v327_v33 = vadd.f32 %v559_v18, %v204_v21  ;;  %v331_v34 = vadd.f32 %v559_v18, %v214_v22 }
  0xb2   :  { %v320_v25 = vadd.f32 %v559_v18, %v186_v23  ;;  %v324_v26 = vadd.f32 %v559_v18, %v196_v24 }
  0xb3   :  { %v343_v41 = vmax.f32 %v327_v33, 0.0  ;;  %v347_v42 = vmax.f32 %v331_v34, 0.0 }
  0xb4   :  { %v336_v29 = vmax.f32 %v320_v25, 0.0  ;;  %v340_v30 = vmax.f32 %v324_v26, 0.0 }
  0xb6   :  { %v486_v31 = vpack.c.bf16 %v336_v29, %v335_v27  ;;  %v496_v32 = vpack.c.bf16 %v340_v30, %v339_v28 }
  0xb8   :  { %487 = vst [vmem:[#allocation8] sm:$0xff] %v486_v31   ;;  %v206_v35 = vpop.f32.mrf.mxu2  ;;  %v216_v36 = vpop.f32.mrf.mxu3 }
  0xb9   :  { %524 = vst [vmem:[#allocation8 + $0x10] sm:$0xff] %v496_v32   ;;  %v328_v37 = vadd.f32 %v559_v18, %v206_v35  ;;  %v332_v38 = vadd.f32 %v559_v18, %v216_v36  ;;  %v189_v39 = vpop.f32.mrf.mxu0  ;;  %v199_v40 = vpop.f32.mrf.mxu1 }
  0xba   :  { %v321_v47 = vadd.f32 %v559_v18, %v189_v39  ;;  %v325_v48 = vadd.f32 %v559_v18, %v199_v40 }
  0xbb   :  { %v344_v43 = vmax.f32 %v328_v37, 0.0  ;;  %v348_v44 = vmax.f32 %v332_v38, 0.0 }
  0xbc   :  { %v337_v55 = vmax.f32 %v321_v47, 0.0  ;;  %v341_v56 = vmax.f32 %v325_v48, 0.0 }
  0xbd   :  { %v506_v45 = vpack.c.bf16 %v344_v43, %v343_v41  ;;  %v516_v46 = vpack.c.bf16 %v348_v44, %v347_v42 }
  0xbf   :  { %526 = vst [vmem:[#allocation8 + $0x20] sm:$0xff] %v506_v45  }
  0xc0   :  { %528 = vst [vmem:[#allocation8 + $0x30] sm:$0xff] %v516_v46   ;;  %v209_v49 = vpop.f32.mrf.mxu2  ;;  %v219_v50 = vpop.f32.mrf.mxu3 }
  0xc1   :  { %v191_v51 = vpop.f32.mrf.mxu0  ;;  %v201_v52 = vpop.f32.mrf.mxu1  ;;  %v329_v61 = vadd.f32 %v559_v18, %v209_v49  ;;  %v333_v62 = vadd.f32 %v559_v18, %v219_v50 }
  0xc2   :  { %v322_v53 = vadd.f32 %v559_v18, %v191_v51  ;;  %v326_v54 = vadd.f32 %v559_v18, %v201_v52 }
  0xc3   :  { %v345_v3 = vmax.f32 %v329_v61, 0.0  ;;  %v349_v4 = vmax.f32 %v333_v62, 0.0 }
  0xc4   :  { %v338_v57 = vmax.f32 %v322_v53, 0.0  ;;  %v342_v58 = vmax.f32 %v326_v54, 0.0 }
  0xc6   :  { %v491_v59 = vpack.c.bf16 %v338_v57, %v337_v55  ;;  %v501_v60 = vpack.c.bf16 %v342_v58, %v341_v56 }
  0xc8   :  { %523 = vst [vmem:[#allocation8 + $0x8] sm:$0xff] %v491_v59   ;;  %v211_v63 = vpop.f32.mrf.mxu2  ;;  %v221_v0 = vpop.f32.mrf.mxu3 }
  0xc9   :  { %525 = vst [vmem:[#allocation8 + $0x18] sm:$0xff] %v501_v60   ;;  %v330_v1 = vadd.f32 %v559_v18, %v211_v63  ;;  %v334_v2 = vadd.f32 %v559_v18, %v221_v0 }
  0xcb   :  { %v346_v5 = vmax.f32 %v330_v1, 0.0  ;;  %v350_v6 = vmax.f32 %v334_v2, 0.0 }
  0xcd   :  { %v511_v7 = vpack.c.bf16 %v346_v5, %v345_v3  ;;  %v521_v8 = vpack.c.bf16 %v350_v6, %v349_v4 }
  0xcf   :  { %527 = vst [vmem:[#allocation8 + $0x28] sm:$0xff] %v511_v7  }
  0xd0   :  { %529 = vst [vmem:[#allocation8 + $0x38] sm:$0xff] %v521_v8  }
  0xd1   :  { %395 = dma.vmem_to_hbm [thread:$0]  %s388_s24, 1024, %s390_s27, [#allocation5], %s639_s20, %s639_s20, %s640_s21  }
  0xd2   :  { %636 = dma.done.wait [#allocation5], 1024  }
  0xd3   :  { %637 = vsyncadd [#allocation5], 4294966272 }
  0xd4   :  { %400 = vsyncpa [#allocation4], 1 }
  0xd5   :  { %401 = vsyncpa [#allocation7], 1 }
  0xd6   :  { %402 = vsyncpa [#allocation5], 1 }

</bundles_post_ra>
